<compile_context>
chip_gen: v7x
topology: tpu7x:2x2x1
jax: 0.10.0
libtpu: 0.0.40
codegen_flags: <defaults>
</compile_context>

<pallas_src>
import functools

import jax
import jax.numpy as jnp
from jax import lax
from jax.experimental import pallas as pl
from jax.experimental.pallas import tpu as pltpu

EPS = 1e-5


# ----------------------------- kernels --------------------------------------


def _layernorm_kernel(x_ref, scale_ref, shift_ref, o_ref):
    """Full-feature-dim LayerNorm on a (tile_rows, D) block."""
    x = x_ref[...].astype(jnp.float32)
    mean = jnp.mean(x, axis=-1, keepdims=True)
    xm = x - mean                                     # reused for var and norm
    var = jnp.mean(xm * xm, axis=-1, keepdims=True)   # population variance
    inv_std = lax.rsqrt(var + EPS)                    # EUP slot
    scale = scale_ref[...].astype(jnp.float32)
    shift = shift_ref[...].astype(jnp.float32)
    o_ref[...] = (xm * (inv_std * scale) + shift).astype(o_ref.dtype)


def _layernorm_packed_kernel(x_ref, scale_ref, shift_ref, bdiag_ref, o_ref, *, d):
    """Lane-packed LayerNorm: each block row holds k = lanes // d logical rows.

    The segmented (per logical row of length d) sum is one MXU matmul against
    the resident block-diagonal ones matrix, which reduces AND broadcasts the
    result back to every lane of its segment in a single op.
    """
    inv_d = 1.0 / float(d)
    x = x_ref[...].astype(jnp.float32)                # (tile_rows, k*d)
    b = bdiag_ref[...]                                # (k*d, k*d) block-diag ones
    mean = jnp.dot(x, b, preferred_element_type=jnp.float32,
                   precision=lax.Precision.HIGHEST) * inv_d
    xm = x - mean
    var = jnp.dot(xm * xm, b, preferred_element_type=jnp.float32,
                  precision=lax.Precision.HIGHEST) * inv_d
    inv_std = lax.rsqrt(var + EPS)
    scale = scale_ref[...].astype(jnp.float32)
    shift = shift_ref[...].astype(jnp.float32)
    o_ref[...] = (xm * (inv_std * scale) + shift).astype(o_ref.dtype)


# ----------------------------- helpers ---------------------------------------


def _round_up(n, m):
    return ((n + m - 1) // m) * m


def _sublane_multiple(dtype):
    # Row-tile alignment: 8 for f32, 16 for bf16, 32 for 1-byte dtypes.
    return max(8, 32 // jnp.dtype(dtype).itemsize)


def _tpu_vmem_and_block_target():
    """(physical VMEM bytes per core, target f32 IO-block bytes)."""
    vmem = None
    try:
        info = pltpu.get_tpu_info()
        for attr in ("vmem_capacity_bytes", "vmem_bytes"):
            v = getattr(info, attr, None)
            if v:
                vmem = int(v)
                break
    except Exception:
        vmem = None
    if vmem is None:
        vmem = 128 << 20                   # v5e / v6e default
    # v7x (64 MiB VMEM, ~3.2 TB/s HBM): bigger blocks halve the relative
    # ~0.35 us/step overhead; v5e/v6e stay at 4 MiB (already <4% overhead).
    target = (8 << 20) if vmem <= (64 << 20) else (4 << 20)
    return vmem, target


def _choose_tile_rows(rows, d_eff, dtype, target_block_bytes, min_steps=2):
    """Largest aligned row tile within the block budget, keeping >= 2 (and
    preferably an even number of) grid steps so both v7x TensorCores get work."""
    itemsize = jnp.dtype(dtype).itemsize
    align = _sublane_multiple(dtype)
    tr_cap = max(align,
                 (target_block_bytes // max(1, d_eff * itemsize)) // align * align)
    steps = pl.cdiv(rows, tr_cap)
    if rows > align:                        # more than one aligned block of rows
        steps = max(steps, min_steps)
        if steps % 2:
            steps += 1
    tr = _round_up(pl.cdiv(rows, steps), align)
    return max(align, min(tr, tr_cap))


def _block_diag_ones(k, d):
    seg = jnp.arange(k * d, dtype=jnp.int32) // d
    return (seg[:, None] == seg[None, :]).astype(jnp.float32)


# ----------------------------- wrapper ----------------------------------------


def layer_norm(x, scale, shift):
    """x: (..., D); scale/shift: (D,). PyTorch-LayerNorm semantics, same dtype."""
    orig_shape = x.shape
    d = orig_shape[-1]
    rows = 1
    for s in orig_shape[:-1]:
        rows *= s
    dtype = x.dtype
    itemsize = jnp.dtype(dtype).itemsize

    # Lane packing for narrow features (lane-dense loads/stores, no vst.msk).
    k = (128 // d) if (d < 128 and 128 % d == 0) else 1
    packed = k > 1 and rows % k == 0
    # TODO(synk): for packable D with rows % k != 0, handle the ragged tail of
    # logical rows instead of falling back to the lane-sparse layout.

    if packed:
        rows_eff, d_eff = rows // k, k * d
        x2 = x.reshape(rows_eff, d_eff)
        scale2 = jnp.tile(scale.reshape(-1), k).reshape(1, d_eff)
        shift2 = jnp.tile(shift.reshape(-1), k).reshape(1, d_eff)
    else:
        rows_eff, d_eff = rows, d
        x2 = x.reshape(rows_eff, d_eff)
        scale2 = scale.reshape(1, d_eff)
        shift2 = shift.reshape(1, d_eff)

    vmem_cap, base_target = _tpu_vmem_and_block_target()
    # Dtype-aware budget: the kernel materializes ~4 f32 copies of the block,
    # so shrink the IO block for sub-f32 inputs to keep the temps in VMEM.
    target = max(1 << 20, (base_target * itemsize) // 4)
    tr = _choose_tile_rows(rows_eff, d_eff, dtype, target)
    grid = pl.cdiv(rows_eff, tr)   # ragged last block: reads padded, stores masked

    block_bytes = tr * d_eff * itemsize
    f32_temp_bytes = 4 * tr * d_eff * 4            # x, mean-bcast, xm, products
    needed = 4 * block_bytes + f32_temp_bytes + (2 << 20)
    limit_cap = max(32 << 20, min(vmem_cap - (8 << 20), 100 << 20))
    vmem_limit = int(min(limit_cap, max(32 << 20, needed)))
    # TODO(synk): very wide D (one aligned row block + f32 temps > limit_cap,
    # mainly v7x's 64 MiB VMEM) needs a two-pass feature-dim-tiled variant.

    row_spec = pl.BlockSpec((tr, d_eff), lambda i: (i, 0))
    vec_spec = pl.BlockSpec((1, d_eff), lambda i: (0, 0))

    if packed:
        kernel = functools.partial(_layernorm_packed_kernel, d=d)
        in_specs = [row_spec, vec_spec, vec_spec,
                    pl.BlockSpec((d_eff, d_eff), lambda i: (0, 0))]
        operands = (x2, scale2, shift2, _block_diag_ones(k, d))
    else:
        kernel = _layernorm_kernel
        in_specs = [row_spec, vec_spec, vec_spec]
        operands = (x2, scale2, shift2)

    out2 = pl.pallas_call(
        kernel,
        out_shape=jax.ShapeDtypeStruct((rows_eff, d_eff), dtype),
        grid_spec=pl.GridSpec(
            grid=(grid,),
            in_specs=in_specs,
            out_specs=row_spec,
        ),
        compiler_params=pltpu.CompilerParams(
            dimension_semantics=("parallel",),
            vmem_limit_bytes=vmem_limit,
        ),
    )(*operands)

    return out2.reshape(orig_shape)


if __name__ == "__main__":
    key = jax.random.PRNGKey(0)
    batch, seq, emb_dim = 2, 8, 32

    x = jax.random.normal(key, (batch, seq, emb_dim), dtype=jnp.float32)

    # Matches nn.Parameter(torch.ones/zeros(emb_dim)) init.
    scale = jnp.ones((emb_dim,), dtype=jnp.float32)
    shift = jnp.zeros((emb_dim,), dtype=jnp.float32)

    out = jax.block_until_ready(layer_norm(x, scale, shift))

    # Reference check in plain JAX (same semantics as the PyTorch module).
    mean = jnp.mean(x, axis=-1, keepdims=True)
    var = jnp.mean((x - mean) ** 2, axis=-1, keepdims=True)
    ref = scale * ((x - mean) / jnp.sqrt(var + EPS)) + shift
    assert jnp.allclose(out, ref, atol=1e-5, rtol=1e-5), "mismatch vs reference"

    print("KERNEL_OK")
</pallas_src>

<mosaic_0001>
module attributes {stable_mosaic.version = 11 : i64} {
  func.func @_layernorm_packed_kernel(%arg0: i32, %arg1: memref<8x128xf32, #tpu.memory_space<vmem>>, %arg2: memref<1x128xf32, #tpu.memory_space<vmem>>, %arg3: memref<1x128xf32, #tpu.memory_space<vmem>>, %arg4: memref<128x128xf32, #tpu.memory_space<vmem>>, %arg5: memref<8x128xf32, #tpu.memory_space<vmem>>) attributes {dimension_semantics = [#tpu.dimension_semantics<parallel>], iteration_bounds = array<i64: 1>, scalar_prefetch = 0 : i64, scratch_operands = 0 : i64, tpu.core_type = #tpu.core_type<tc>, window_params = [{transform_indices = @transform_0, window_bounds = array<i64: 8, 128>}, {pipeline_mode = #tpu.pipeline_mode<synchronous>, transform_indices = @transform_1, window_bounds = array<i64: 1, 128>}, {pipeline_mode = #tpu.pipeline_mode<synchronous>, transform_indices = @transform_2, window_bounds = array<i64: 1, 128>}, {pipeline_mode = #tpu.pipeline_mode<synchronous>, transform_indices = @transform_3, window_bounds = array<i64: 128, 128>}, {transform_indices = @transform_4, window_bounds = array<i64: 8, 128>}]} {
    %c0 = arith.constant 0 : index
    %c0_0 = arith.constant 0 : index
    %0 = vector.load %arg1[%c0, %c0_0] : memref<8x128xf32, #tpu.memory_space<vmem>>, vector<8x128xf32>
    %c0_1 = arith.constant 0 : index
    %c0_2 = arith.constant 0 : index
    %1 = vector.load %arg4[%c0_1, %c0_2] : memref<128x128xf32, #tpu.memory_space<vmem>>, vector<128x128xf32>
    %cst = arith.constant dense<0.000000e+00> : vector<8x128xf32>
    %2 = tpu.matmul %0, %1, %cst {dimension_numbers = #tpu.dot_dimension_numbers<[1], [0], [0], [1], [0, 0, 1, 1], [], []>, precision = #tpu.contract_precision<fp32>} : vector<8x128xf32>, vector<128x128xf32>, vector<8x128xf32> -> vector<8x128xf32>
    %cst_3 = arith.constant 3.125000e-02 : f32
    %3 = vector.broadcast %cst_3 : f32 to vector<8x128xf32>
    %4 = arith.mulf %2, %3 : vector<8x128xf32>
    %5 = arith.subf %0, %4 : vector<8x128xf32>
    %6 = arith.mulf %5, %5 : vector<8x128xf32>
    %cst_4 = arith.constant dense<0.000000e+00> : vector<8x128xf32>
    %7 = tpu.matmul %6, %1, %cst_4 {dimension_numbers = #tpu.dot_dimension_numbers<[1], [0], [0], [1], [0, 0, 1, 1], [], []>, precision = #tpu.contract_precision<fp32>} : vector<8x128xf32>, vector<128x128xf32>, vector<8x128xf32> -> vector<8x128xf32>
    %cst_5 = arith.constant 3.125000e-02 : f32
    %8 = vector.broadcast %cst_5 : f32 to vector<8x128xf32>
    %9 = arith.mulf %7, %8 : vector<8x128xf32>
    %cst_6 = arith.constant 9.99999974E-6 : f32
    %10 = vector.broadcast %cst_6 : f32 to vector<8x128xf32>
    %11 = arith.addf %9, %10 : vector<8x128xf32>
    %12 = math.rsqrt %11 : vector<8x128xf32>
    %c0_7 = arith.constant 0 : index
    %c0_8 = arith.constant 0 : index
    %13 = vector.load %arg2[%c0_7, %c0_8] : memref<1x128xf32, #tpu.memory_space<vmem>>, vector<1x128xf32>
    %c0_9 = arith.constant 0 : index
    %c0_10 = arith.constant 0 : index
    %14 = vector.load %arg3[%c0_9, %c0_10] : memref<1x128xf32, #tpu.memory_space<vmem>>, vector<1x128xf32>
    %15 = vector.broadcast %13 : vector<1x128xf32> to vector<8x128xf32>
    %16 = arith.mulf %12, %15 : vector<8x128xf32>
    %17 = arith.mulf %5, %16 : vector<8x128xf32>
    %18 = vector.broadcast %14 : vector<1x128xf32> to vector<8x128xf32>
    %19 = arith.addf %17, %18 : vector<8x128xf32>
    %c0_11 = arith.constant 0 : index
    %c0_12 = arith.constant 0 : index
    %20 = vector.load %arg5[%c0_11, %c0_12] : memref<8x128xf32, #tpu.memory_space<vmem>>, vector<8x128xf32>
    tpu.vector_store %arg5[%c0_11, %c0_12], %19 {strides = array<i32>} : memref<8x128xf32, #tpu.memory_space<vmem>>, vector<8x128xf32>,
    return
  }
  func.func @transform_0(%arg0: i32) -> (i32, i32) {
    %c0_i32 = arith.constant 0 : i32
    %c0_i32_0 = arith.constant 0 : i32
    return %arg0, %c0_i32 : i32, i32
  }
  func.func @transform_1(%arg0: i32) -> (i32, i32) {
    %c0_i32 = arith.constant 0 : i32
    %c0_i32_0 = arith.constant 0 : i32
    %c0_i32_1 = arith.constant 0 : i32
    return %c0_i32, %c0_i32_0 : i32, i32
  }
  func.func @transform_2(%arg0: i32) -> (i32, i32) {
    %c0_i32 = arith.constant 0 : i32
    %c0_i32_0 = arith.constant 0 : i32
    %c0_i32_1 = arith.constant 0 : i32
    return %c0_i32, %c0_i32_0 : i32, i32
  }
  func.func @transform_3(%arg0: i32) -> (i32, i32) {
    %c0_i32 = arith.constant 0 : i32
    %c0_i32_0 = arith.constant 0 : i32
    %c0_i32_1 = arith.constant 0 : i32
    return %c0_i32, %c0_i32_0 : i32, i32
  }
  func.func @transform_4(%arg0: i32) -> (i32, i32) {
    %c0_i32 = arith.constant 0 : i32
    %c0_i32_0 = arith.constant 0 : i32
    return %arg0, %c0_i32 : i32, i32
  }
}

</mosaic_0001>

<bundles_post_ra>
// kernel: tpu_custom_call.1
= control target key start
LH: loop header
LB: loop body
LE: loop exit
PB: predicated region body
PF: predicated region fallthrough
CT: control target
= control target key end

     0   :  { %9 = vsyncpa [#allocation3], 0  ;;  %s2879_s0 = inlined_call_operand.hbm [shape: f32[4,128], index: 0, kind: input, shape index: {}]   ;;  %s2880_s1 = inlined_call_operand.vmem [shape: f32[1,128], index: 1, kind: input, shape index: {}]   ;;  %s2881_s2 = inlined_call_operand.vmem [shape: f32[1,128], index: 2, kind: input, shape index: {}]   ;;  %s2882_s3 = inlined_call_operand.hbm [shape: f32[128,128], index: 3, kind: input, shape index: {}]   ;;  %s2883_s4 = inlined_call_operand.hbm [shape: f32[4,128], index: 4, kind: output, shape index: {}]  }
   0x1   :  { %10 = vsyncpa [#allocation6], 0 }
   0x2   :  { %11 = vsyncpa [#allocation4], 0 }
   0x3   :  { %16 = vsyncadd [#allocation3], 64  ;;  %s2405_s15 = smov [#allocation2]   ;;  %s2333_s19 = scalar_lea.hbm %s2879_s0, 64 }
   0x4   :  { %s17_s16 = sshll.u32 %s2405_s15, 4  ;;  %p2334_p0 = scmp.ne.s32.totalorder %s2879_s0, %s2333_s19  ;;  %s18_s16 = int_to_ptr.vmem [resolvable:$true] %s17_s16 }
   0x5   :  { %p2337_p1 = scmp.lt.u32.totalorder %s2333_s19, %s2879_s0 }
   0x7   :  { %p2339_p2 = pnand %p2337_p1, %p2334_p0 }
   0x9   :  { %2342 = shalt.err (!%p2339_p2)
}
   0xa   :  { %s2343_s24 = scalar_lea.vmem %s18_s16, 64  ;;  %s2347_s25 = scalar_lea.vmem %s18_s16, 128 }
   0xb   :  { %p2344_p3 = scmp.ne.s32.totalorder %s18_s16, %s2343_s24  ;;  %p2348_p4 = scmp.lt.s32.totalorder %s18_s16, %s18_s16 }
   0xc   :  { %p2349_p5 = scmp.lt.s32.totalorder %s2347_s25, %s2343_s24 }
   0xe   :  { %p2350_p6 = por %p2349_p5, %p2348_p4 }
  0x10   :  { %p2351_p7 = pnand %p2350_p6, %p2344_p3 }
  0x12   :  { %2354 = shalt.err (!%p2351_p7)
}
  0x13   :  { %s2406_s26 = smov 64   ;;  %s2407_s27 = smov 4  }
  0x14   :  { %23 = dma.hbm_to_vmem [thread:$0]  %s2879_s0, 64, %s18_s16, [#allocation3], %s2406_s26, %s2406_s26, %s2407_s27  }
  0x15   :  { %s2408_s30 = smov [#allocation5]   ;;  %s2355_s8 = scalar_lea.hbm %s2882_s3, 2048 }
  0x16   :  { %s33_s5 = sshll.u32 %s2408_s30, 4  ;;  %p2356_p8 = scmp.ne.s32.totalorder %s2882_s3, %s2355_s8  ;;  %s34_s5 = int_to_ptr.vmem [resolvable:$true] %s33_s5 }
  0x17   :  { %p2359_p9 = scmp.lt.u32.totalorder %s2355_s8, %s2882_s3 }
  0x19   :  { %p2361_p10 = pnand %p2359_p9, %p2356_p8 }
  0x1b   :  { %2364 = shalt.err (!%p2361_p10)
}
  0x1c   :  { %s2365_s13 = scalar_lea.vmem %s34_s5, 2048  ;;  %p2370_p12 = scmp.lt.s32.totalorder %s34_s5, %s34_s5 }
  0x1d   :  { %p2366_p11 = scmp.ne.s32.totalorder %s34_s5, %s2365_s13  ;;  %p2371_p13 = scmp.lt.s32.totalorder %s2365_s13, %s2365_s13 }
  0x1f   :  { %p2372_p0 = por %p2371_p13, %p2370_p12 }
  0x21   :  { %p2373_p1 = pnand %p2372_p0, %p2366_p11 }
  0x23   :  { %2376 = shalt.err (!%p2373_p1)
}
  0x24   :  { %s2409_s0 = smov 128   ;;  %s2410_s14 = smov 8  }
  0x25   :  { %39 = dma.hbm_to_vmem [thread:$0]  %s2882_s3, 2048, %s34_s5, [#allocation6], %s2409_s0, %s2409_s0, %s2410_s14  }
  0x26   :  { %2399 = dma.done.wait [#allocation3], 128  }
  0x27   :  { %2400 = vsyncadd [#allocation3], 4294967168 }
  0x28   :  { %2401 = dma.done.wait [#allocation6], 2048  }
  0x29   :  { %2402 = vsyncadd [#allocation6], 4294965248  ;;  %v2411_v0 = vmov 0.0|0.0   ;;  %vm2412_vm0 = vmmov 0   ;;  %v2413_v1 = vmov 0.0   ;;  %v47_v2 = vld [vmem:[#allocation5] sm:$0xff] }
  0x2a   :  { %2013 = vmatprep.subr.bf16.mxu0 %v2411_v0  ;;  %1625 = vmatprep.mubr.msk.f32.mxu0 %vm2412_vm0, %v2413_v1  ;;  %v48_v3 = vld [vmem:[#allocation5 + $0x8] sm:$0xff]  ;;  %v49_v4 = vld [vmem:[#allocation5 + $0x10] sm:$0xff]  ;;  %v64_v5 = vand.u32 4294901760, %v47_v2  ;;  %v50_v7 = vld [vmem:[#allocation5 + $0x18] sm:$0xff] }
  0x2b   :  { %2157 = vmatprep.subr.bf16.mxu1 %v2411_v0  ;;  %1835 = vmatprep.mubr.msk.f32.mxu1 %vm2412_vm0, %v2413_v1  ;;  %v67_v6 = vand.u32 4294901760, %v48_v3  ;;  %v70_v8 = vand.u32 4294901760, %v49_v4  ;;  %v73_v9 = vand.u32 4294901760, %v50_v7  ;;  %v51_v10 = vld [vmem:[#allocation5 + $0x20] sm:$0xff]  ;;  %v52_v11 = vld [vmem:[#allocation5 + $0x28] sm:$0xff]  ;;  %v53_v16 = vld [vmem:[#allocation5 + $0x30] sm:$0xff] }
  0x2c   :  { %v76_v14 = vand.u32 4294901760, %v51_v10  ;;  %v79_v15 = vand.u32 4294901760, %v52_v11  ;;  %v54_v17 = vld [vmem:[#allocation5 + $0x38] sm:$0xff]  ;;  %v82_v19 = vand.u32 4294901760, %v53_v16  ;;  %v55_v21 = vld [vmem:[#allocation5 + $0x40] sm:$0xff]  ;;  %v56_v23 = vld [vmem:[#allocation5 + $0x48] sm:$0xff]  ;;  %v2495_v34 = vsub.f32 %v47_v2, %v64_v5 }
  0x2d   :  { %v2473_v12 = vpack.c.bf16 %v67_v6, %v64_v5  ;;  %v2476_v13 = vpack.c.bf16 %v73_v9, %v70_v8  ;;  %v85_v20 = vand.u32 4294901760, %v54_v17  ;;  %v2484_v22 = vld [vmem:[#allocation2] sm:$0xff]  ;;  %v57_v24 = vld [vmem:[#allocation5 + $0x50] sm:$0xff]  ;;  %v59_v26 = vld [vmem:[#allocation5 + $0x60] sm:$0xff]  ;;  %v88_v27 = vand.u32 4294901760, %v55_v21 }
  0x2e   :  { %v2482_v18 = vpack.c.bf16 %v79_v15, %v76_v14  ;;  %v58_v25 = vld [vmem:[#allocation5 + $0x58] sm:$0xff]  ;;  %v60_v28 = vld [vmem:[#allocation5 + $0x68] sm:$0xff]  ;;  %v61_v29 = vld [vmem:[#allocation5 + $0x70] sm:$0xff]  ;;  %v2490_v31 = vand.u32 4294901760, %v2484_v22  ;;  %v91_v33 = vand.u32 4294901760, %v56_v23  ;;  %v2497_v35 = vsub.f32 %v48_v3, %v67_v6 }
  0x2f   :  { %2015 = vmatpush3.bf16.msra.mxu0 %v2473_v12  ;;  %2159 = vmatpush3.bf16.msra.mxu1 %v2473_v12  ;;  %v62_v30 = vld [vmem:[#allocation5 + $0x78] sm:$0xff]  ;;  %v2493_v32 = vpack.c.bf16 %v85_v20, %v82_v19  ;;  %v94_v36 = vand.u32 4294901760, %v57_v24  ;;  %v97_v37 = vand.u32 4294901760, %v58_v25  ;;  %v100_v38 = vand.u32 4294901760, %v59_v26 }
  0x30   :  { %2016 = vmatprep.subr.bf16.mxu0 %v2411_v0  ;;  %2160 = vmatprep.subr.bf16.mxu1 %v2411_v0  ;;  %v103_v39 = vand.u32 4294901760, %v60_v28  ;;  %v106_v40 = vand.u32 4294901760, %v61_v29  ;;  %v109_v41 = vand.u32 4294901760, %v62_v30  ;;  %v2504_v42 = vsub.f32 %v2484_v22, %v2490_v31 }
  0x31   :  { %v2506_v43 = vsub.f32 %v49_v4, %v70_v8  ;;  %v2509_v44 = vpack.c.bf16 %v91_v33, %v88_v27  ;;  %v157_v45 = vand.u32 4294901760, %v2495_v34  ;;  %v164_v46 = vand.u32 4294901760, %v2497_v35 }
  0x32   :  { %v2513_v47 = vsub.f32 %v50_v7, %v73_v9  ;;  %v2517_v48 = vsub.f32 %v51_v10, %v76_v14  ;;  %v2520_v49 = vpack.c.bf16 %v97_v37, %v94_v36  ;;  %v2522_v50 = vpack.c.bf16 %v103_v39, %v100_v38 }
  0x33   :  { %2018 = vmatpush3.bf16.msra.mxu0 %v2476_v13  ;;  %2162 = vmatpush3.bf16.msra.mxu1 %v2476_v13  ;;  %v2524_v51 = vpack.c.bf16 %v109_v41, %v106_v40  ;;  %v146_v52 = vand.u32 4294901760, %v2504_v42  ;;  %v171_v53 = vand.u32 4294901760, %v2506_v43  ;;  %v2528_v54 = vsub.f32 %v52_v11, %v79_v15 }
  0x34   :  { %2019 = vmatprep.subr.bf16.mxu0 %v2411_v0  ;;  %2163 = vmatprep.subr.bf16.mxu1 %v2411_v0  ;;  %v2530_v55 = vsub.f32 %v53_v16, %v82_v19  ;;  %v158_v56 = vsub.f32 %v2495_v34, %v157_v45  ;;  %v165_v57 = vsub.f32 %v2497_v35, %v164_v46  ;;  %v178_v58 = vand.u32 4294901760, %v2513_v47 }
  0x35   :  { %v2536_v59 = vsub.f32 %v54_v17, %v85_v20  ;;  %v185_v60 = vand.u32 4294901760, %v2517_v48  ;;  %v2541_v61 = vsub.f32 %v55_v21, %v88_v27  ;;  %v2543_v62 = vsub.f32 %v56_v23, %v91_v33 }
  0x36   :  { %v2545_v63 = vsub.f32 %v57_v24, %v94_v36  ;;  %v2548_v2 = vsub.f32 %v58_v25, %v97_v37  ;;  %v2550_v3 = vsub.f32 %v59_v26, %v100_v38  ;;  %v2552_v4 = vsub.f32 %v60_v28, %v103_v39 }
  0x37   :  { %2021 = vmatpush3.bf16.msra.mxu0 %v2482_v18  ;;  %2165 = vmatpush3.bf16.msra.mxu1 %v2482_v18  ;;  %v2554_v5 = vsub.f32 %v61_v29, %v106_v40  ;;  %v147_v6 = vsub.f32 %v2504_v42, %v146_v52  ;;  %v172_v7 = vsub.f32 %v2506_v43, %v171_v53  ;;  %v192_v8 = vand.u32 4294901760, %v2528_v54 }
  0x38   :  { %2022 = vmatprep.subr.bf16.mxu0 %v2411_v0  ;;  %2166 = vmatprep.subr.bf16.mxu1 %v2411_v0  ;;  %v2561_v9 = vsub.f32 %v62_v30, %v109_v41  ;;  %v159_v10 = vand.u32 4294901760, %v158_v56  ;;  %v166_v11 = vand.u32 4294901760, %v165_v57  ;;  %v179_v14 = vsub.f32 %v2513_v47, %v178_v58 }
  0x39   :  { %v199_v15 = vand.u32 4294901760, %v2530_v55  ;;  %v206_v16 = vand.u32 4294901760, %v2536_v59  ;;  %v213_v17 = vand.u32 4294901760, %v2541_v61  ;;  %v220_v19 = vand.u32 4294901760, %v2543_v62 }
  0x3a   :  { %v227_v20 = vand.u32 4294901760, %v2545_v63  ;;  %v234_v21 = vand.u32 4294901760, %v2548_v2  ;;  %v241_v23 = vand.u32 4294901760, %v2550_v3  ;;  %v248_v24 = vand.u32 4294901760, %v2552_v4 }
  0x3b   :  { %2024 = vmatpush3.bf16.msra.mxu0 %v2493_v32  ;;  %2168 = vmatpush3.bf16.msra.mxu1 %v2493_v32  ;;  %v255_v25 = vand.u32 4294901760, %v2554_v5  ;;  %v262_v26 = vand.u32 4294901760, %v2561_v9  ;;  %v2578_v27 = vpack.c.bf16 %v164_v46, %v157_v45  ;;  %v2580_v28 = vpack.c.bf16 %v178_v58, %v171_v53 }
  0x3c   :  { %2025 = vmatprep.subr.bf16.mxu0 %v2411_v0  ;;  %2169 = vmatprep.subr.bf16.mxu1 %v2411_v0  ;;  %v2582_v29 = vpack.c.bf16 %v192_v8, %v185_v60  ;;  %v2585_v30 = vpack.c.bf16 %v206_v16, %v199_v15  ;;  %v2587_v33 = vpack.c.bf16 %v220_v19, %v213_v17  ;;  %v148_v39 = vand.u32 4294901760, %v147_v6 }
  0x3d   :  { %v2589_v36 = vpack.c.bf16 %v234_v21, %v227_v20  ;;  %v2591_v37 = vpack.c.bf16 %v248_v24, %v241_v23  ;;  %v2594_v38 = vpack.c.bf16 %v262_v26, %v255_v25  ;;  %v186_v40 = vsub.f32 %v2517_v48, %v185_v60 }
  0x3e   :  { %v2600_v41 = vpack.c.bf16 %v166_v11, %v159_v10  ;;  %v173_v45 = vand.u32 4294901760, %v172_v7  ;;  %v180_v46 = vand.u32 4294901760, %v179_v14  ;;  %v193_v53 = vsub.f32 %v2528_v54, %v192_v8 }
  0x3f   :  { %2027 = vmatpush3.bf16.msra.mxu0 %v2509_v44  ;;  %2171 = vmatpush3.bf16.msra.mxu1 %v2509_v44  ;;  %v200_v56 = vsub.f32 %v2530_v55, %v199_v15  ;;  %v187_v58 = vand.u32 4294901760, %v186_v40  ;;  %v207_v6 = vsub.f32 %v2536_v59, %v206_v16  ;;  %v214_v11 = vsub.f32 %v2541_v61, %v213_v17 }
  0x40   :  { %2028 = vmatprep.subr.bf16.mxu0 %v2411_v0  ;;  %2172 = vmatprep.subr.bf16.mxu1 %v2411_v0  ;;  %v2608_v57 = vpack.c.bf16 %v180_v46, %v173_v45  ;;  %v194_v60 = vand.u32 4294901760, %v193_v53  ;;  %v221_v14 = vsub.f32 %v2543_v62, %v220_v19  ;;  %v228_v15 = vsub.f32 %v2545_v63, %v227_v20 }
  0x41   :  { %v201_v7 = vand.u32 4294901760, %v200_v56  ;;  %v208_v10 = vand.u32 4294901760, %v207_v6  ;;  %v235_v45 = vsub.f32 %v2548_v2, %v234_v21  ;;  %v242_v46 = vsub.f32 %v2550_v3, %v241_v23 }
  0x42   :  { %v2615_v8 = vpack.c.bf16 %v194_v60, %v187_v58  ;;  %v222_v40 = vand.u32 4294901760, %v221_v14  ;;  %v229_v19 = vand.u32 4294901760, %v228_v15  ;;  %v249_v20 = vsub.f32 %v2552_v4, %v248_v24 }
  0x43   :  { %2030 = vmatpush3.bf16.msra.mxu0 %v2520_v49  ;;  %2174 = vmatpush3.bf16.msra.mxu1 %v2520_v49  ;;  %v2622_v16 = vpack.c.bf16 %v208_v10, %v201_v7  ;;  %v236_v53 = vand.u32 4294901760, %v235_v45  ;;  %v256_v56 = vsub.f32 %v2554_v5, %v255_v25  ;;  %v243_v21 = vand.u32 4294901760, %v242_v46 }
  0x44   :  { %2031 = vmatprep.subr.bf16.mxu0 %v2411_v0  ;;  %2175 = vmatprep.subr.bf16.mxu1 %v2411_v0  ;;  %v250_v60 = vand.u32 4294901760, %v249_v20  ;;  %v263_v23 = vsub.f32 %v2561_v9, %v262_v26  ;;  %v2649_v26 = vpack.c.bf16 %v2497_v35, %v2495_v34  ;;  %v2656_v10 = vpack.c.bf16 %v2513_v47, %v2506_v43 }
  0x45   :  { %v2634_v58 = vpack.c.bf16 %v236_v53, %v229_v19  ;;  %v257_v7 = vand.u32 4294901760, %v256_v56  ;;  %v2664_v34 = vpack.c.bf16 %v2528_v54, %v2517_v48  ;;  %v2670_v35 = vpack.c.bf16 %v2536_v59, %v2530_v55 }
  0x46   :  { %v2639_v6 = vpack.c.bf16 %v250_v60, %v243_v21  ;;  %v264_v24 = vand.u32 4294901760, %v263_v23  ;;  %v2676_v43 = vpack.c.bf16 %v2543_v62, %v2541_v61  ;;  %v2682_v47 = vpack.c.bf16 %v2548_v2, %v2545_v63 }
  0x47   :  { %2033 = vmatpush3.bf16.msra.mxu0 %v2522_v50  ;;  %2177 = vmatpush3.bf16.msra.mxu1 %v2522_v50  ;;  %v2688_v48 = vpack.c.bf16 %v2552_v4, %v2550_v3  ;;  %v2694_v54 = vpack.c.bf16 %v2561_v9, %v2554_v5 }
  0x48   :  { %2034 = vmatprep.subr.bf16.mxu0 %v2411_v0  ;;  %2178 = vmatprep.subr.bf16.mxu1 %v2411_v0  ;;  %v2643_v25 = vpack.c.bf16 %v264_v24, %v257_v7 }
  0x4b   :  { %2036 = vmatpush3.bf16.msra.mxu0 %v2524_v51  ;;  %2180 = vmatpush3.bf16.msra.mxu1 %v2524_v51 }
  0x4c   :  { %2037 = vmatprep.subr.bf16.mxu0 %v2411_v0  ;;  %2181 = vmatprep.subr.bf16.mxu1 %v2411_v0 }
  0x4e   :  { %1626 = vmatmul.mubr.f32.vlgmr.msra.gmra.mrb[0].mxu0 %v148_v39  ;;  %v215_v39 = vand.u32 4294901760, %v214_v11 }
  0x4f   :  { %2039 = vmatpush3.bf16.msra.mxu0 %v2600_v41  ;;  %1660 = vmatprep.mubr.msk.f32.mxu0 %vm2412_vm0, %v2413_v1 }
  0x50   :  { %2040 = vmatprep.subr.bf16.mxu0 %v2411_v0  ;;  %v2628_v17 = vpack.c.bf16 %v222_v40, %v215_v39 }
  0x53   :  { %2042 = vmatpush3.bf16.msra.mxu0 %v2608_v57 }
  0x54   :  { %2043 = vmatprep.subr.bf16.mxu0 %v2411_v0 }
  0x57   :  { %2045 = vmatpush3.bf16.msra.mxu0 %v2615_v8 }
  0x58   :  { %2046 = vmatprep.subr.bf16.mxu0 %v2411_v0 }
  0x5b   :  { %2048 = vmatpush3.bf16.msra.mxu0 %v2622_v16 }
  0x5c   :  { %2049 = vmatprep.subr.bf16.mxu0 %v2411_v0 }
  0x5f   :  { %2051 = vmatpush3.bf16.msra.mxu0 %v2628_v17 }
  0x60   :  { %2052 = vmatprep.subr.bf16.mxu0 %v2411_v0 }
  0x63   :  { %2054 = vmatpush3.bf16.msra.mxu0 %v2634_v58 }
  0x64   :  { %2055 = vmatprep.subr.bf16.mxu0 %v2411_v0 }
  0x67   :  { %2057 = vmatpush3.bf16.msra.mxu0 %v2639_v6 }
  0x68   :  { %2058 = vmatprep.subr.bf16.mxu0 %v2411_v0 }
  0x6b   :  { %2060 = vmatpush3.bf16.msra.mxu0 %v2643_v25 }
  0x6c   :  { %2061 = vmatprep.subr.bf16.mxu0 %v2411_v0 }
  0x6e   :  { %1661 = vmatmul.mubr.f32.vlgmr.msra.gmra.mrb[0].mxu0 %v2490_v31 }
  0x6f   :  { %2063 = vmatpush3.bf16.msra.mxu0 %v2649_v26  ;;  %1695 = vmatprep.mubr.msk.f32.mxu0 %vm2412_vm0, %v2413_v1 }
  0x70   :  { %2064 = vmatprep.subr.bf16.mxu0 %v2411_v0 }
  0x73   :  { %2066 = vmatpush3.bf16.msra.mxu0 %v2656_v10 }
  0x74   :  { %2067 = vmatprep.subr.bf16.mxu0 %v2411_v0 }
  0x77   :  { %2069 = vmatpush3.bf16.msra.mxu0 %v2664_v34 }
  0x78   :  { %2070 = vmatprep.subr.bf16.mxu0 %v2411_v0 }
  0x7b   :  { %2072 = vmatpush3.bf16.msra.mxu0 %v2670_v35 }
  0x7c   :  { %2073 = vmatprep.subr.bf16.mxu0 %v2411_v0 }
  0x7f   :  { %2075 = vmatpush3.bf16.msra.mxu0 %v2676_v43 }
  0x80   :  { %2076 = vmatprep.subr.bf16.mxu0 %v2411_v0 }
  0x83   :  { %2078 = vmatpush3.bf16.msra.mxu0 %v2682_v47 }
  0x84   :  { %2079 = vmatprep.subr.bf16.mxu0 %v2411_v0 }
  0x87   :  { %2081 = vmatpush3.bf16.msra.mxu0 %v2688_v48 }
  0x88   :  { %2082 = vmatprep.subr.bf16.mxu0 %v2411_v0 }
  0x8b   :  { %2084 = vmatpush3.bf16.msra.mxu0 %v2694_v54 }
  0x8c   :  { %2085 = vmatprep.subr.bf16.mxu0 %v2411_v0 }
  0x8e   :  { %1696 = vmatmul.mubr.f32.vlgmr.msra.gmra.mrb[0].mxu0 %v2504_v42 }
  0x8f   :  { %2087 = vmatpush3.bf16.msra.mxu0 %v2473_v12  ;;  %1730 = vmatprep.mubr.msk.f32.mxu0 %vm2412_vm0, %v2413_v1 }
  0x90   :  { %2088 = vmatprep.subr.bf16.mxu0 %v2411_v0 }
  0x93   :  { %2090 = vmatpush3.bf16.msra.mxu0 %v2476_v13 }
  0x94   :  { %2091 = vmatprep.subr.bf16.mxu0 %v2411_v0 }
  0x97   :  { %2093 = vmatpush3.bf16.msra.mxu0 %v2482_v18 }
  0x98   :  { %2094 = vmatprep.subr.bf16.mxu0 %v2411_v0 }
  0x9b   :  { %2096 = vmatpush3.bf16.msra.mxu0 %v2493_v32 }
  0x9c   :  { %2097 = vmatprep.subr.bf16.mxu0 %v2411_v0 }
  0x9f   :  { %2099 = vmatpush3.bf16.msra.mxu0 %v2509_v44 }
  0xa0   :  { %2100 = vmatprep.subr.bf16.mxu0 %v2411_v0 }
  0xa3   :  { %2102 = vmatpush3.bf16.msra.mxu0 %v2520_v49 }
  0xa4   :  { %2103 = vmatprep.subr.bf16.mxu0 %v2411_v0 }
  0xa7   :  { %2105 = vmatpush3.bf16.msra.mxu0 %v2522_v50 }
  0xa8   :  { %2106 = vmatprep.subr.bf16.mxu0 %v2411_v0 }
  0xab   :  { %2108 = vmatpush3.bf16.msra.mxu0 %v2524_v51 }
  0xac   :  { %2109 = vmatprep.subr.bf16.mxu0 %v2411_v0 }
  0xae   :  { %1731 = vmatmul.mubr.f32.vlgmr.msra.gmra.mrb[0].mxu0 %v146_v52 }
  0xaf   :  { %2111 = vmatpush3.bf16.msra.mxu0 %v2578_v27  ;;  %1765 = vmatprep.mubr.msk.f32.mxu0 %vm2412_vm0, %v2413_v1 }
  0xb0   :  { %2112 = vmatprep.subr.bf16.mxu0 %v2411_v0 }
  0xb3   :  { %2114 = vmatpush3.bf16.msra.mxu0 %v2580_v28 }
  0xb4   :  { %2115 = vmatprep.subr.bf16.mxu0 %v2411_v0 }
  0xb7   :  { %2117 = vmatpush3.bf16.msra.mxu0 %v2582_v29 }
  0xb8   :  { %2118 = vmatprep.subr.bf16.mxu0 %v2411_v0 }
  0xbb   :  { %2120 = vmatpush3.bf16.msra.mxu0 %v2585_v30 }
  0xbc   :  { %2121 = vmatprep.subr.bf16.mxu0 %v2411_v0 }
  0xbf   :  { %2123 = vmatpush3.bf16.msra.mxu0 %v2587_v33 }
  0xc0   :  { %2124 = vmatprep.subr.bf16.mxu0 %v2411_v0 }
  0xc3   :  { %2126 = vmatpush3.bf16.msra.mxu0 %v2589_v36 }
  0xc4   :  { %2127 = vmatprep.subr.bf16.mxu0 %v2411_v0 }
  0xc7   :  { %2129 = vmatpush3.bf16.msra.mxu0 %v2591_v37 }
  0xc8   :  { %2130 = vmatprep.subr.bf16.mxu0 %v2411_v0 }
  0xcb   :  { %2132 = vmatpush3.bf16.msra.mxu0 %v2594_v38 }
  0xcc   :  { %2133 = vmatprep.subr.bf16.mxu0 %v2411_v0 }
  0xce   :  { %1766 = vmatmul.mubr.f32.vlgmr.msra.gmra.mrb[0].mxu0 %v2490_v31 }
  0xcf   :  { %2135 = vmatpush3.bf16.msra.mxu0 %v2473_v12  ;;  %1800 = vmatprep.mubr.msk.f32.mxu0 %vm2412_vm0, %v2413_v1 }
  0xd0   :  { %2136 = vmatprep.subr.bf16.mxu0 %v2411_v0 }
  0xd3   :  { %2138 = vmatpush3.bf16.msra.mxu0 %v2476_v13 }
  0xd4   :  { %2139 = vmatprep.subr.bf16.mxu0 %v2411_v0 }
  0xd7   :  { %2141 = vmatpush3.bf16.msra.mxu0 %v2482_v18 }
  0xd8   :  { %2142 = vmatprep.subr.bf16.mxu0 %v2411_v0 }
  0xdb   :  { %2144 = vmatpush3.bf16.msra.mxu0 %v2493_v32 }
  0xdc   :  { %2145 = vmatprep.subr.bf16.mxu0 %v2411_v0 }
  0xdf   :  { %2147 = vmatpush3.bf16.msra.mxu0 %v2509_v44 }
  0xe0   :  { %2148 = vmatprep.subr.bf16.mxu0 %v2411_v0 }
  0xe3   :  { %2150 = vmatpush3.bf16.msra.mxu0 %v2520_v49 }
  0xe4   :  { %2151 = vmatprep.subr.bf16.mxu0 %v2411_v0 }
  0xe7   :  { %2153 = vmatpush3.bf16.msra.mxu0 %v2522_v50 }
  0xe8   :  { %2154 = vmatprep.subr.bf16.mxu0 %v2411_v0 }
  0xeb   :  { %2156 = vmatpush3.bf16.msra.mxu0 %v2524_v51 }
  0xee   :  { %1801 = vmatmul.mubr.f32.vlgmr.msra.gmra.mrb[0].mxu0 %v2490_v31 }
 0x1c1   :  { %v700_v42 = vpop.f32.mrb[0].mxu0 }
 0x1c2   :  { %v704_v52 = vmul.f32 0.03125, %v700_v42  ;;  %v1802_v55 = vpop.f32.mrb[1].mxu0 }
 0x1c4   :  { %v2758_v59 = vsub.f32 %v2484_v22, %v704_v52  ;;  %v1387_v22 = vld [vmem:[%s2880_s1] ss:$0 sm:$0xff] }
 0x1c6   :  { %v706_v61 = vmul.f32 %v2758_v59, %v2758_v59 }
 0x1c8   :  { %v2762_v62 = vand.u32 4294901760, %v706_v61 }
 0x1ca   :  { %v789_v63 = vsub.f32 %v706_v61, %v2762_v62 }
 0x1cc   :  { %v790_v2 = vand.u32 4294901760, %v789_v63 }
 0x1ce   :  { %v791_v3 = vsub.f32 %v789_v63, %v790_v2 }
 0x1d0   :  { %v792_v4 = vand.u32 4294901760, %v791_v3 }
 0x1d2   :  { %1836 = vmatmul.mubr.f32.vlgmr.msra.gmra.mrb[0].mxu1 %v792_v4 }
 0x1d3   :  { %2183 = vmatpush3.bf16.msra.mxu1 %v2600_v41  ;;  %1870 = vmatprep.mubr.msk.f32.mxu1 %vm2412_vm0, %v2413_v1 }
 0x1d4   :  { %2184 = vmatprep.subr.bf16.mxu1 %v2411_v0 }
 0x1d7   :  { %2186 = vmatpush3.bf16.msra.mxu1 %v2608_v57 }
 0x1d8   :  { %2187 = vmatprep.subr.bf16.mxu1 %v2411_v0 }
 0x1db   :  { %2189 = vmatpush3.bf16.msra.mxu1 %v2615_v8 }
 0x1dc   :  { %2190 = vmatprep.subr.bf16.mxu1 %v2411_v0 }
 0x1df   :  { %2192 = vmatpush3.bf16.msra.mxu1 %v2622_v16 }
 0x1e0   :  { %2193 = vmatprep.subr.bf16.mxu1 %v2411_v0 }
 0x1e3   :  { %2195 = vmatpush3.bf16.msra.mxu1 %v2628_v17 }
 0x1e4   :  { %2196 = vmatprep.subr.bf16.mxu1 %v2411_v0 }
 0x1e7   :  { %2198 = vmatpush3.bf16.msra.mxu1 %v2634_v58 }
 0x1e8   :  { %2199 = vmatprep.subr.bf16.mxu1 %v2411_v0 }
 0x1eb   :  { %2201 = vmatpush3.bf16.msra.mxu1 %v2639_v6 }
 0x1ec   :  { %2202 = vmatprep.subr.bf16.mxu1 %v2411_v0 }
 0x1ef   :  { %2204 = vmatpush3.bf16.msra.mxu1 %v2643_v25 }
 0x1f0   :  { %2205 = vmatprep.subr.bf16.mxu1 %v2411_v0 }
 0x1f2   :  { %1871 = vmatmul.mubr.f32.vlgmr.msra.gmra.mrb[0].mxu1 %v2762_v62 }
 0x1f3   :  { %2207 = vmatpush3.bf16.msra.mxu1 %v2649_v26  ;;  %1905 = vmatprep.mubr.msk.f32.mxu1 %vm2412_vm0, %v2413_v1 }
 0x1f4   :  { %2208 = vmatprep.subr.bf16.mxu1 %v2411_v0 }
 0x1f7   :  { %2210 = vmatpush3.bf16.msra.mxu1 %v2656_v10 }
 0x1f8   :  { %2211 = vmatprep.subr.bf16.mxu1 %v2411_v0 }
 0x1fb   :  { %2213 = vmatpush3.bf16.msra.mxu1 %v2664_v34 }
 0x1fc   :  { %2214 = vmatprep.subr.bf16.mxu1 %v2411_v0 }
 0x1ff   :  { %2216 = vmatpush3.bf16.msra.mxu1 %v2670_v35 }
 0x200   :  { %2217 = vmatprep.subr.bf16.mxu1 %v2411_v0 }
 0x203   :  { %2219 = vmatpush3.bf16.msra.mxu1 %v2676_v43 }
 0x204   :  { %2220 = vmatprep.subr.bf16.mxu1 %v2411_v0 }
 0x207   :  { %2222 = vmatpush3.bf16.msra.mxu1 %v2682_v47 }
 0x208   :  { %2223 = vmatprep.subr.bf16.mxu1 %v2411_v0 }
 0x20b   :  { %2225 = vmatpush3.bf16.msra.mxu1 %v2688_v48 }
 0x20c   :  { %2226 = vmatprep.subr.bf16.mxu1 %v2411_v0 }
 0x20f   :  { %2228 = vmatpush3.bf16.msra.mxu1 %v2694_v54 }
 0x210   :  { %2229 = vmatprep.subr.bf16.mxu1 %v2411_v0 }
 0x212   :  { %1906 = vmatmul.mubr.f32.vlgmr.msra.gmra.mrb[0].mxu1 %v789_v63 }
 0x213   :  { %2231 = vmatpush3.bf16.msra.mxu1 %v2473_v12  ;;  %1940 = vmatprep.mubr.msk.f32.mxu1 %vm2412_vm0, %v2413_v1 }
 0x214   :  { %2232 = vmatprep.subr.bf16.mxu1 %v2411_v0 }
 0x217   :  { %2234 = vmatpush3.bf16.msra.mxu1 %v2476_v13 }
 0x218   :  { %2235 = vmatprep.subr.bf16.mxu1 %v2411_v0 }
 0x21b   :  { %2237 = vmatpush3.bf16.msra.mxu1 %v2482_v18 }
 0x21c   :  { %2238 = vmatprep.subr.bf16.mxu1 %v2411_v0 }
 0x21f   :  { %2240 = vmatpush3.bf16.msra.mxu1 %v2493_v32 }
 0x220   :  { %2241 = vmatprep.subr.bf16.mxu1 %v2411_v0 }
 0x223   :  { %2243 = vmatpush3.bf16.msra.mxu1 %v2509_v44 }
 0x224   :  { %2244 = vmatprep.subr.bf16.mxu1 %v2411_v0 }
 0x227   :  { %2246 = vmatpush3.bf16.msra.mxu1 %v2520_v49 }
 0x228   :  { %2247 = vmatprep.subr.bf16.mxu1 %v2411_v0 }
 0x22b   :  { %2249 = vmatpush3.bf16.msra.mxu1 %v2522_v50 }
 0x22c   :  { %2250 = vmatprep.subr.bf16.mxu1 %v2411_v0 }
 0x22f   :  { %2252 = vmatpush3.bf16.msra.mxu1 %v2524_v51 }
 0x230   :  { %2253 = vmatprep.subr.bf16.mxu1 %v2411_v0 }
 0x232   :  { %1941 = vmatmul.mubr.f32.vlgmr.msra.gmra.mrb[0].mxu1 %v790_v2 }
 0x233   :  { %2255 = vmatpush3.bf16.msra.mxu1 %v2578_v27  ;;  %1975 = vmatprep.mubr.msk.f32.mxu1 %vm2412_vm0, %v2413_v1 }
 0x234   :  { %2256 = vmatprep.subr.bf16.mxu1 %v2411_v0 }
 0x237   :  { %2258 = vmatpush3.bf16.msra.mxu1 %v2580_v28 }
 0x238   :  { %2259 = vmatprep.subr.bf16.mxu1 %v2411_v0 }
 0x23b   :  { %2261 = vmatpush3.bf16.msra.mxu1 %v2582_v29 }
 0x23c   :  { %2262 = vmatprep.subr.bf16.mxu1 %v2411_v0 }
 0x23f   :  { %2264 = vmatpush3.bf16.msra.mxu1 %v2585_v30 }
 0x240   :  { %2265 = vmatprep.subr.bf16.mxu1 %v2411_v0 }
 0x243   :  { %2267 = vmatpush3.bf16.msra.mxu1 %v2587_v33 }
 0x244   :  { %2268 = vmatprep.subr.bf16.mxu1 %v2411_v0 }
 0x247   :  { %2270 = vmatpush3.bf16.msra.mxu1 %v2589_v36 }
 0x248   :  { %2271 = vmatprep.subr.bf16.mxu1 %v2411_v0 }
 0x24b   :  { %2273 = vmatpush3.bf16.msra.mxu1 %v2591_v37 }
 0x24c   :  { %2274 = vmatprep.subr.bf16.mxu1 %v2411_v0 }
 0x24f   :  { %2276 = vmatpush3.bf16.msra.mxu1 %v2594_v38 }
 0x250   :  { %2277 = vmatprep.subr.bf16.mxu1 %v2411_v0 }
 0x252   :  { %1976 = vmatmul.mubr.f32.vlgmr.msra.gmra.mrb[0].mxu1 %v2762_v62 }
 0x253   :  { %2279 = vmatpush3.bf16.msra.mxu1 %v2473_v12  ;;  %2010 = vmatprep.mubr.msk.f32.mxu1 %vm2412_vm0, %v2413_v1 }
 0x254   :  { %2280 = vmatprep.subr.bf16.mxu1 %v2411_v0 }
 0x257   :  { %2282 = vmatpush3.bf16.msra.mxu1 %v2476_v13 }
 0x258   :  { %2283 = vmatprep.subr.bf16.mxu1 %v2411_v0 }
 0x25b   :  { %2285 = vmatpush3.bf16.msra.mxu1 %v2482_v18 }
 0x25c   :  { %2286 = vmatprep.subr.bf16.mxu1 %v2411_v0 }
 0x25f   :  { %2288 = vmatpush3.bf16.msra.mxu1 %v2493_v32 }
 0x260   :  { %2289 = vmatprep.subr.bf16.mxu1 %v2411_v0 }
 0x263   :  { %2291 = vmatpush3.bf16.msra.mxu1 %v2509_v44  ;;  %v1388_v44 = vld [vmem:[%s2881_s2] ss:$0 sm:$0xff] }
 0x264   :  { %2292 = vmatprep.subr.bf16.mxu1 %v2411_v0 }
 0x267   :  { %2294 = vmatpush3.bf16.msra.mxu1 %v2520_v49 }
 0x268   :  { %2295 = vmatprep.subr.bf16.mxu1 %v2411_v0 }
 0x26b   :  { %2297 = vmatpush3.bf16.msra.mxu1 %v2522_v50 }
 0x26c   :  { %2298 = vmatprep.subr.bf16.mxu1 %v2411_v0 }
 0x26f   :  { %2300 = vmatpush3.bf16.msra.mxu1 %v2524_v51 }
 0x272   :  { %2011 = vmatmul.mubr.f32.vlgmr.msra.gmra.mrb[0].mxu1 %v2762_v62 }
 0x345   :  { %v1344_v1 = vpop.f32.mrb[0].mxu1 }
 0x346   :  { %v1348_v12 = vmul.f32 0.03125, %v1344_v1  ;;  %v2012_v13 = vpop.f32.mrb[1].mxu1 }
 0x348   :  { %v1349_v18 = vadd.f32 1e-05, %v1348_v12 }
 0x34a   :  { %2331 = vrsqrt.f32 %v1349_v18 }
 0x354   :  { %v2332_v31 = vpop.eup %2331 }
 0x355   :  { %v1359_v32 = vmul.f32 %v2332_v31, %v1387_v22 }
 0x357   :  { %v1360_v0 = vmul.f32 %v1359_v32, %v2758_v59 }
 0x359   :  { %v1367_v49 = vadd.f32 %v1388_v44, %v1360_v0 }
 0x35b   :  { %1368 = vst [vmem:[#allocation7] sm:$0xff] %v1367_v49 }
 0x35c   :  { %1373 = vsyncadd [#allocation4], 64  ;;  %s2414_s20 = smov [#allocation7]  }
 0x35d   :  { %s1374_s21 = sshll.u32 %s2414_s20, 4  ;;  %s1375_s21 = int_to_ptr.vmem [resolvable:$true] %s1374_s21 }
 0x35e   :  { %s2377_s22 = scalar_lea.vmem %s1375_s21, 64  ;;  %s2381_s23 = scalar_lea.vmem %s1375_s21, 128 }
 0x35f   :  { %p2378_p2 = scmp.ne.s32.totalorder %s1375_s21, %s2377_s22  ;;  %p2382_p3 = scmp.lt.s32.totalorder %s1375_s21, %s1375_s21 }
 0x360   :  { %p2383_p4 = scmp.lt.s32.totalorder %s2381_s23, %s2377_s22 }
 0x362   :  { %p2384_p5 = por %p2383_p4, %p2382_p3 }
 0x364   :  { %p2385_p6 = pnand %p2384_p5, %p2378_p2 }
 0x366   :  { %2388 = shalt.err (!%p2385_p6)
}
 0x367   :  { %s2389_s2 = scalar_lea.hbm %s2883_s4, 64 }
 0x368   :  { %p2390_p7 = scmp.ne.s32.totalorder %s2883_s4, %s2389_s2  ;;  %p2393_p8 = scmp.lt.u32.totalorder %s2389_s2, %s2883_s4 }
 0x36a   :  { %p2395_p9 = pnand %p2393_p8, %p2390_p7 }
 0x36c   :  { %2398 = shalt.err (!%p2395_p9)
}
 0x36d   :  { %1380 = dma.vmem_to_hbm [thread:$0]  %s1375_s21, 64, %s2883_s4, [#allocation4], %s2406_s26, %s2406_s26, %s2407_s27  }
 0x36e   :  { %2403 = dma.done.wait [#allocation4], 128  }
 0x36f   :  { %2404 = vsyncadd [#allocation4], 4294967168 }
 0x370   :  { %1384 = vsyncpa [#allocation3], 1 }
 0x371   :  { %1385 = vsyncpa [#allocation6], 1 }
 0x372   :  { %1386 = vsyncpa [#allocation4], 1 }

</bundles_post_ra>
